<compile_context>
chip_gen: v6e
topology: v6e:2x2x1
jax: 0.10.0
libtpu: 0.0.40
codegen_flags: <defaults>
</compile_context>

<pallas_src>
import functools

import jax
import jax.numpy as jnp
from jax import lax
from jax.experimental import pallas as pl
from jax.experimental.pallas import tpu as pltpu


def _tpu_generation():
    """Best-effort TPU generation (int) or None; only gates the bf16 fast path."""
    try:
        dev = jax.devices()[0]
        if dev.platform != "tpu":
            return None
        kind = dev.device_kind.lower()
        for g in (7, 6, 5, 4, 3, 2):
            if f"v{g}" in kind:
                return g
    except Exception:
        return None
    return None


def _pick_tiles(c_pad):
    """Asymmetric (Tr, Tc) tile pick; c_pad is a multiple of 128.

    Tc (key tile)   <= 512 : bounds the lane-padded (Tc, B) x^T buffer + XLU reduce length.
    Tr (query tile) <= 2048: amortizes per-step overhead and epilogue/writeback per q-tile.
    Tc*Tr <= 1M f32 elems  : keeps the (Tc, Tr) score/exp temporaries v7x-(64 MiB)-safe.
    Prefer >= 2 query tiles so the "parallel" grid axis can use both v7x TensorCores.
    """
    cands = [t for t in range(c_pad, 0, -128) if c_pad % t == 0]   # descending, /128
    tc = next(t for t in cands if t <= 512)
    cap = 1 << 20
    ok = [t for t in cands if t <= 2048 and t * tc <= cap]
    prefer = [t for t in ok if c_pad // t >= 2]
    tr = prefer[0] if prefer else ok[0]
    return tr, tc


def _nonlocal_flash_kernel(params_ref,   # SMEM (6 + 2*cout,) f32 packed conv scalars
                           xq_ref,       # VMEM (B, Tr)  x block (query tile i): q + residual
                           xkT_ref,      # VMEM (Tc, B)  x^T block (key tile j): k AND v cols
                           out_ref,      # VMEM (B*cout*B, Tr) dense output slab
                           m_sc, l_sc, acc_sc,
                           *, hw, tc, cout, need_mask, compute_dtype):
    j = pl.program_id(1)
    nj = pl.num_programs(1)

    @pl.when(j == 0)
    def _init():
        m_sc[...] = jnp.full_like(m_sc, -jnp.inf)
        l_sc[...] = jnp.zeros_like(l_sc)
        acc_sc[...] = jnp.zeros_like(acc_sc)

    wq, bq = params_ref[0], params_ref[1]
    wk, bk = params_ref[2], params_ref[3]
    wv, bv = params_ref[4], params_ref[5]

    # 1x1 convs are scalar affines (module constraint Cin == OC2 == 1).
    x_q = xq_ref[...]                         # (B, Tr) f32; raw x reused for the residual
    x_kT = xkT_ref[...]                       # (Tc, B) f32; one stream feeds both k and v
    q = wq * x_q + bq                         # (B, Tr)  f32
    kT = wk * x_kT + bk                       # (Tc, B)  key columns
    vT = wv * x_kT + bv                       # (Tc, B)  value columns

    bsz = q.shape[0]
    use_vpu = bsz <= 16                       # B far below the MXU tile dim -> VPU/XLU wins

    if use_vpu:
        # Scores as B broadcasted outer products on the VPU (bf16 on v6e/v7x).
        qc = q.astype(compute_dtype)
        kTc = kT.astype(compute_dtype)
        s_T = kTc[:, 0:1] * qc[0:1, :]                                  # (Tc, Tr)
        for b in range(1, bsz):
            s_T = s_T + kTc[:, b:b + 1] * qc[b:b + 1, :]
    else:
        # Large-batch fallback: natural (M,K)x(K,N) layouts, no XLU transpose (f32 MXU).
        s_T = lax.dot_general(kT, q, (((1,), (0,)), ((), ())),
                              preferred_element_type=jnp.float32)       # (Tc, Tr)

    if need_mask:
        # Mask key positions that only exist because C was padded up to a multiple of 128.
        kidx = lax.broadcasted_iota(jnp.int32, (tc, 1), 0) + j * tc
        s_T = jnp.where(kidx < hw, s_T, -jnp.inf)

    # Online softmax over the key axis (sublanes of s_T); normalization deferred.
    m_cur = jnp.max(s_T, axis=0, keepdims=True).astype(jnp.float32)     # (1, Tr)
    m_new = jnp.maximum(m_sc[...], m_cur)                               # (1, Tr) f32
    alpha = jnp.exp(m_sc[...] - m_new)                                  # (1, Tr) f32
    e = jnp.exp(s_T - m_new.astype(s_T.dtype))                          # (Tc, Tr) compute dt
    e_f32 = e if e.dtype == jnp.float32 else e.astype(jnp.float32)      # f32 accumulation

    l_sc[...] = alpha * l_sc[...] + jnp.sum(e_f32, axis=0, keepdims=True)

    if use_vpu:
        # PV as VPU multiplies + XLU sublane reductions (no M=B MXU matmul).
        pv_rows = [jnp.sum(vT[:, b:b + 1] * e_f32, axis=0, keepdims=True)
                   for b in range(bsz)]
        pv = pv_rows[0] if bsz == 1 else jnp.concatenate(pv_rows, axis=0)   # (B, Tr)
    else:
        pv = lax.dot_general(vT, e_f32, (((0,), (0,)), ((), ())),
                             preferred_element_type=jnp.float32)            # (B, Tr)

    acc_sc[...] = alpha * acc_sc[...] + pv
    m_sc[...] = m_new

    @pl.when(j == nj - 1)
    def _epilogue():
        inv_l = pl.reciprocal(l_sc[...], approx=True)                   # (1, Tr)
        a = acc_sc[...] * inv_l                                         # (B, Tr)
        # Dense (B*cout*B, Tr) slab: row = b1*(cout*B) + o*B + b2,
        #   value = wo[o]*a[b1, :] + bo[o] + x[b2, :]   (out_conv + broadcast residual).
        rows = []
        for b1 in range(bsz):
            for o in range(cout):
                y = params_ref[6 + o] * a[b1:b1 + 1, :] + params_ref[6 + cout + o]
                for b2 in range(bsz):
                    rows.append(y + x_q[b2:b2 + 1, :])
        slab = rows[0] if len(rows) == 1 else jnp.concatenate(rows, axis=0)
        out_ref[...] = slab                                             # one dense store


def nonlocal_block_pallas(x, wq, bq, wk, bk, wv, bv, wo, bo):
    b, cin, h, w = x.shape
    oc2, cin_w = wq.shape
    cout = wo.shape[0]
    # Shape constraints imposed by the original torch forward (see header comment).
    assert cin == cin_w and oc2 == cout // 2
    assert cin == 1 and oc2 == 1 and h == 1, (
        "NonLocalBlock only executes with in_channels == out_channels//2 == 1 and H == 1")
    hw = h * w

    x2 = x.reshape(b, hw).astype(jnp.float32)        # (B, C), C == H*W
    c_pad = ((hw + 127) // 128) * 128                # pad C to a lane multiple
    if c_pad != hw:
        x2 = jnp.pad(x2, ((0, 0), (0, c_pad - hw)))
    x2t = x2.T                                       # (C_pad, B): key-side columns

    # Pack all 1x1-conv scalars into one small SMEM array:
    #   [wq, bq, wk, bk, wv, bv, wo_0..wo_{cout-1}, bo_0..bo_{cout-1}]
    params = jnp.concatenate([
        wq.reshape(-1), bq.reshape(-1),
        wk.reshape(-1), bk.reshape(-1),
        wv.reshape(-1), bv.reshape(-1),
        wo.reshape(-1), bo.reshape(-1),
    ]).astype(jnp.float32)

    tr, tc = _pick_tiles(c_pad)
    ni, nj = c_pad // tr, c_pad // tc
    rows = b * cout * b                              # flattened output rows (= 8 here)

    gen = _tpu_generation()
    compute_dtype = jnp.bfloat16 if gen in (6, 7) else jnp.float32   # v5e: no bf16 VPU/EUP

    kernel = functools.partial(
        _nonlocal_flash_kernel, hw=hw, tc=tc, cout=cout,
        need_mask=(c_pad != hw), compute_dtype=compute_dtype)

    grid_spec = pltpu.PrefetchScalarGridSpec(
        num_scalar_prefetch=0,
        grid=(ni, nj),                               # i: query tiles (parallel), j: key tiles
        in_specs=[
            pl.BlockSpec(memory_space=pltpu.MemorySpace.SMEM),   # packed conv scalars
            pl.BlockSpec((b, tr), lambda i, j: (0, i)),          # x   -> q + residual
            pl.BlockSpec((tc, b), lambda i, j: (j, 0)),          # x^T -> k and v columns
        ],
        out_specs=pl.BlockSpec((rows, tr), lambda i, j: (0, i)),
        scratch_shapes=[
            pltpu.VMEM((1, tr), jnp.float32),        # running row max m
            pltpu.VMEM((1, tr), jnp.float32),        # running row sum l
            pltpu.VMEM((b, tr), jnp.float32),        # un-normalized attention output
        ],
    )

    out2 = pl.pallas_call(
        kernel,
        out_shape=jax.ShapeDtypeStruct((rows, c_pad), jnp.float32),
        grid_spec=grid_spec,
        compiler_params=pltpu.CompilerParams(
            dimension_semantics=("parallel", "arbitrary"),
            vmem_limit_bytes=32 * 1024 * 1024),      # raise v5e's 16 MiB default
    )(params, x2, x2t)

    if c_pad != hw:
        out2 = out2[:, :hw]                          # drop padded query columns
    # torch's permute(2,1,0,3).reshape(b,-1,h,w) is already baked into the row ordering.
    return out2.reshape(b, cout * b, h, w)


def nonlocal_block_reference(x, wq, bq, wk, bk, wv, bv, wo, bo):
    """Pure-JAX mirror of the torch forward (with the intended 'bc,bd->cd' attention)."""
    b, cin, h, w = x.shape
    oc2 = wq.shape[0]

    def conv1x1(inp, wt, bias):                   # inp NCHW, wt (co, ci)
        return (jnp.einsum('oc,nchw->nohw', wt, inp, precision='highest')
                + bias[None, :, None, None])

    q = conv1x1(x, wq, bq).transpose(0, 2, 3, 1).reshape(b, -1)
    k = conv1x1(x, wk, bk).transpose(0, 2, 3, 1).reshape(b, -1)
    v = conv1x1(x, wv, bv).transpose(0, 2, 3, 1).reshape(b, -1)
    att = jax.nn.softmax(jnp.einsum('bc,bd->cd', q, k, precision='highest'), axis=1)
    out = jnp.einsum('cd,bd->bc', att, v, precision='highest')[None]   # (1, b, C)
    out = out.reshape(1, b, h * w, oc2).transpose(0, 3, 1, 2)          # (1, oc2, b, hw)
    out = conv1x1(out, wo, bo) + x                                     # broadcast residual
    return out.transpose(2, 1, 0, 3).reshape(b, -1, h, w)


if __name__ == "__main__":
    # Shapes consistent with what the forward pass actually allows (see header).
    B, CIN, H = 2, 1, 1
    COUT = 2 * CIN
    OC2 = COUT // 2

    key = jax.random.PRNGKey(0)
    kx, k1, k2, k3, k4, k5, k6, k7, k8 = jax.random.split(key, 9)
    wq = 0.5 * jax.random.normal(k1, (OC2, CIN), jnp.float32)
    bq = 0.1 * jax.random.normal(k2, (OC2,), jnp.float32)
    wk = 0.5 * jax.random.normal(k3, (OC2, CIN), jnp.float32)
    bk = 0.1 * jax.random.normal(k4, (OC2,), jnp.float32)
    wv = 0.5 * jax.random.normal(k5, (OC2, CIN), jnp.float32)
    bv = 0.1 * jax.random.normal(k6, (OC2,), jnp.float32)
    wo = 0.5 * jax.random.normal(k7, (COUT, OC2), jnp.float32)
    bo = 0.1 * jax.random.normal(k8, (COUT,), jnp.float32)

    # W=16 exercises the pad-to-128 + key-masking path; W=512 exercises the tiled
    # multi-query-tile path (grid (2, 1), dense (8, Tr) output slab per query tile).
    for W in (16, 512):
        x = jax.random.normal(kx, (B, CIN, H, W), jnp.float32)
        out = jax.block_until_ready(
            nonlocal_block_pallas(x, wq, bq, wk, bk, wv, bv, wo, bo))
        ref = nonlocal_block_reference(x, wq, bq, wk, bk, wv, bv, wo, bo)
        assert out.shape == ref.shape == (B, COUT * B, H, W), (out.shape, ref.shape)
        if not jnp.allclose(out, ref, rtol=2e-2, atol=2e-2):
            raise AssertionError(
                f"W={W}: mismatch vs reference, max abs err = "
                f"{float(jnp.max(jnp.abs(out - ref)))}")

    print("KERNEL_OK")
</pallas_src>

<mosaic_0001>
module attributes {stable_mosaic.version = 11 : i64} {
  func.func @_nonlocal_flash_kernel(%arg0: i32, %arg1: i32, %arg2: memref<10xf32, #tpu.memory_space<smem>>, %arg3: memref<2x128xf32, #tpu.memory_space<vmem>>, %arg4: memref<128x2xf32, #tpu.memory_space<vmem>>, %arg5: memref<8x128xf32, #tpu.memory_space<vmem>>, %arg6: memref<1x128xf32, #tpu.memory_space<vmem>>, %arg7: memref<1x128xf32, #tpu.memory_space<vmem>>, %arg8: memref<2x128xf32, #tpu.memory_space<vmem>>) attributes {dimension_semantics = [#tpu.dimension_semantics<parallel>, #tpu.dimension_semantics<arbitrary>], iteration_bounds = array<i64: 1, 1>, scalar_prefetch = 0 : i64, scratch_operands = 3 : i64, tpu.core_type = #tpu.core_type<tc>, window_params = [{transform_indices = @transform_0, window_bounds = array<i64: 10>}, {transform_indices = @transform_1, window_bounds = array<i64: 2, 128>}, {transform_indices = @transform_2, window_bounds = array<i64: 128, 2>}, {transform_indices = @transform_3, window_bounds = array<i64: 8, 128>}]} {
    %c0_i32 = arith.constant 0 : i32
    %0 = arith.cmpi eq, %arg1, %c0_i32 : i32
    %1 = arith.extui %0 : i1 to i32
    %c0_i32_0 = arith.constant 0 : i32
    %2 = arith.cmpi ne, %1, %c0_i32_0 : i32
    scf.if %2 {
      %cst_25 = arith.constant 0xFF800000 : f32
      %80 = vector.broadcast %cst_25 : f32 to vector<1x128xf32>
      %c0_26 = arith.constant 0 : index
      %c0_27 = arith.constant 0 : index
      %81 = vector.load %arg6[%c0_26, %c0_27] : memref<1x128xf32, #tpu.memory_space<vmem>>, vector<1x128xf32>
      tpu.vector_store %arg6[%c0_26, %c0_27], %80 {strides = array<i32>} : memref<1x128xf32, #tpu.memory_space<vmem>>, vector<1x128xf32>,
      %cst_28 = arith.constant 0.000000e+00 : f32
      %82 = vector.broadcast %cst_28 : f32 to vector<1x128xf32>
      %c0_29 = arith.constant 0 : index
      %c0_30 = arith.constant 0 : index
      %83 = vector.load %arg7[%c0_29, %c0_30] : memref<1x128xf32, #tpu.memory_space<vmem>>, vector<1x128xf32>
      tpu.vector_store %arg7[%c0_29, %c0_30], %82 {strides = array<i32>} : memref<1x128xf32, #tpu.memory_space<vmem>>, vector<1x128xf32>,
      %cst_31 = arith.constant 0.000000e+00 : f32
      %84 = vector.broadcast %cst_31 : f32 to vector<2x128xf32>
      %c0_32 = arith.constant 0 : index
      %c0_33 = arith.constant 0 : index
      %85 = vector.load %arg8[%c0_32, %c0_33] : memref<2x128xf32, #tpu.memory_space<vmem>>, vector<2x128xf32>
      tpu.vector_store %arg8[%c0_32, %c0_33], %84 {strides = array<i32>} : memref<2x128xf32, #tpu.memory_space<vmem>>, vector<2x128xf32>,
    } else {
    }
    %c0 = arith.constant 0 : index
    %3 = memref.load %arg2[%c0] : memref<10xf32, #tpu.memory_space<smem>>
    %c1 = arith.constant 1 : index
    %4 = memref.load %arg2[%c1] : memref<10xf32, #tpu.memory_space<smem>>
    %c2 = arith.constant 2 : index
    %5 = memref.load %arg2[%c2] : memref<10xf32, #tpu.memory_space<smem>>
    %c3 = arith.constant 3 : index
    %6 = memref.load %arg2[%c3] : memref<10xf32, #tpu.memory_space<smem>>
    %c4 = arith.constant 4 : index
    %7 = memref.load %arg2[%c4] : memref<10xf32, #tpu.memory_space<smem>>
    %c5 = arith.constant 5 : index
    %8 = memref.load %arg2[%c5] : memref<10xf32, #tpu.memory_space<smem>>
    %c0_1 = arith.constant 0 : index
    %c0_2 = arith.constant 0 : index
    %9 = vector.load %arg3[%c0_1, %c0_2] : memref<2x128xf32, #tpu.memory_space<vmem>>, vector<2x128xf32>
    %c0_3 = arith.constant 0 : index
    %c0_4 = arith.constant 0 : index
    %10 = vector.load %arg4[%c0_3, %c0_4] : memref<128x2xf32, #tpu.memory_space<vmem>>, vector<128x2xf32>
    %11 = vector.broadcast %3 : f32 to vector<2x128xf32>
    %12 = arith.mulf %11, %9 : vector<2x128xf32>
    %13 = vector.broadcast %4 : f32 to vector<2x128xf32>
    %14 = arith.addf %12, %13 : vector<2x128xf32>
    %15 = vector.broadcast %5 : f32 to vector<128x2xf32>
    %16 = arith.mulf %15, %10 : vector<128x2xf32>
    %17 = vector.broadcast %6 : f32 to vector<128x2xf32>
    %18 = arith.addf %16, %17 : vector<128x2xf32>
    %19 = vector.broadcast %7 : f32 to vector<128x2xf32>
    %20 = arith.mulf %19, %10 : vector<128x2xf32>
    %21 = vector.broadcast %8 : f32 to vector<128x2xf32>
    %22 = arith.addf %20, %21 : vector<128x2xf32>
    %23 = vector.extract_strided_slice %18 {offsets = [0, 0], sizes = [128, 1], strides = [1, 1]} : vector<128x2xf32> to vector<128x1xf32>
    %24 = vector.extract_strided_slice %14 {offsets = [0, 0], sizes = [1, 128], strides = [1, 1]} : vector<2x128xf32> to vector<1x128xf32>
    %25 = vector.broadcast %23 : vector<128x1xf32> to vector<128x128xf32>
    %26 = vector.broadcast %24 : vector<1x128xf32> to vector<128x128xf32>
    %27 = arith.mulf %25, %26 : vector<128x128xf32>
    %28 = vector.extract_strided_slice %18 {offsets = [0, 1], sizes = [128, 1], strides = [1, 1]} : vector<128x2xf32> to vector<128x1xf32>
    %29 = vector.extract_strided_slice %14 {offsets = [1, 0], sizes = [1, 128], strides = [1, 1]} : vector<2x128xf32> to vector<1x128xf32>
    %30 = vector.broadcast %28 : vector<128x1xf32> to vector<128x128xf32>
    %31 = vector.broadcast %29 : vector<1x128xf32> to vector<128x128xf32>
    %32 = arith.mulf %30, %31 : vector<128x128xf32>
    %33 = arith.addf %27, %32 : vector<128x128xf32>
    %34 = tpu.iota {dimensions = array<i32: 0>} : vector<128x1xi32>
    %c128_i32 = arith.constant 128 : i32
    %35 = arith.muli %arg1, %c128_i32 : i32
    %36 = vector.broadcast %35 : i32 to vector<128x1xi32>
    %37 = arith.addi %34, %36 : vector<128x1xi32>
    %c16_i32 = arith.constant 16 : i32
    %38 = vector.broadcast %c16_i32 : i32 to vector<128x1xi32>
    %39 = arith.cmpi slt, %37, %38 : vector<128x1xi32>
    %cst = arith.constant 0xFF800000 : f32
    %40 = vector.shape_cast %39 : vector<128x1xi1> to vector<128x1xi1>
    %41 = vector.broadcast %40 : vector<128x1xi1> to vector<128x128xi1>
    %42 = vector.broadcast %cst : f32 to vector<128x128xf32>
    %43 = arith.select %41, %33, %42 : vector<128x128xi1>, vector<128x128xf32>
    %cst_5 = arith.constant dense<0xFF800000> : vector<128xf32>
    %44 = vector.multi_reduction <maximumf>, %43, %cst_5 [0] : vector<128x128xf32> to vector<128xf32>
    %45 = vector.shape_cast %44 : vector<128xf32> to vector<1x128xf32>
    %c0_6 = arith.constant 0 : index
    %c0_7 = arith.constant 0 : index
    %46 = vector.load %arg6[%c0_6, %c0_7] : memref<1x128xf32, #tpu.memory_space<vmem>>, vector<1x128xf32>
    %47 = arith.maximumf %46, %45 : vector<1x128xf32>
    %c0_8 = arith.constant 0 : index
    %c0_9 = arith.constant 0 : index
    %48 = vector.load %arg6[%c0_8, %c0_9] : memref<1x128xf32, #tpu.memory_space<vmem>>, vector<1x128xf32>
    %49 = arith.subf %48, %47 : vector<1x128xf32>
    %50 = math.exp %49 : vector<1x128xf32>
    %51 = vector.broadcast %47 : vector<1x128xf32> to vector<128x128xf32>
    %52 = arith.subf %43, %51 : vector<128x128xf32>
    %53 = math.exp %52 : vector<128x128xf32>
    %c0_10 = arith.constant 0 : index
    %c0_11 = arith.constant 0 : index
    %54 = vector.load %arg7[%c0_10, %c0_11] : memref<1x128xf32, #tpu.memory_space<vmem>>, vector<1x128xf32>
    %55 = arith.mulf %50, %54 : vector<1x128xf32>
    %cst_12 = arith.constant dense<0.000000e+00> : vector<128xf32>
    %56 = vector.multi_reduction <add>, %53, %cst_12 [0] : vector<128x128xf32> to vector<128xf32>
    %57 = vector.shape_cast %56 : vector<128xf32> to vector<1x128xf32>
    %58 = arith.addf %55, %57 : vector<1x128xf32>
    %c0_13 = arith.constant 0 : index
    %c0_14 = arith.constant 0 : index
    %59 = vector.load %arg7[%c0_13, %c0_14] : memref<1x128xf32, #tpu.memory_space<vmem>>, vector<1x128xf32>
    tpu.vector_store %arg7[%c0_13, %c0_14], %58 {strides = array<i32>} : memref<1x128xf32, #tpu.memory_space<vmem>>, vector<1x128xf32>,
    %60 = vector.extract_strided_slice %22 {offsets = [0, 0], sizes = [128, 1], strides = [1, 1]} : vector<128x2xf32> to vector<128x1xf32>
    %61 = vector.broadcast %60 : vector<128x1xf32> to vector<128x128xf32>
    %62 = arith.mulf %61, %53 : vector<128x128xf32>
    %cst_15 = arith.constant dense<0.000000e+00> : vector<128xf32>
    %63 = vector.multi_reduction <add>, %62, %cst_15 [0] : vector<128x128xf32> to vector<128xf32>
    %64 = vector.shape_cast %63 : vector<128xf32> to vector<1x128xf32>
    %65 = vector.extract_strided_slice %22 {offsets = [0, 1], sizes = [128, 1], strides = [1, 1]} : vector<128x2xf32> to vector<128x1xf32>
    %66 = vector.broadcast %65 : vector<128x1xf32> to vector<128x128xf32>
    %67 = arith.mulf %66, %53 : vector<128x128xf32>
    %cst_16 = arith.constant dense<0.000000e+00> : vector<128xf32>
    %68 = vector.multi_reduction <add>, %67, %cst_16 [0] : vector<128x128xf32> to vector<128xf32>
    %69 = vector.shape_cast %68 : vector<128xf32> to vector<1x128xf32>
    %70 = tpu.concatenate %64, %69 in 0 : vector<1x128xf32>, vector<1x128xf32> -> vector<2x128xf32>
    %c0_17 = arith.constant 0 : index
    %c0_18 = arith.constant 0 : index
    %71 = vector.load %arg8[%c0_17, %c0_18] : memref<2x128xf32, #tpu.memory_space<vmem>>, vector<2x128xf32>
    %72 = vector.broadcast %50 : vector<1x128xf32> to vector<2x128xf32>
    %73 = arith.mulf %72, %71 : vector<2x128xf32>
    %74 = arith.addf %73, %70 : vector<2x128xf32>
    %c0_19 = arith.constant 0 : index
    %c0_20 = arith.constant 0 : index
    %75 = vector.load %arg8[%c0_19, %c0_20] : memref<2x128xf32, #tpu.memory_space<vmem>>, vector<2x128xf32>
    tpu.vector_store %arg8[%c0_19, %c0_20], %74 {strides = array<i32>} : memref<2x128xf32, #tpu.memory_space<vmem>>, vector<2x128xf32>,
    %c0_21 = arith.constant 0 : index
    %c0_22 = arith.constant 0 : index
    %76 = vector.load %arg6[%c0_21, %c0_22] : memref<1x128xf32, #tpu.memory_space<vmem>>, vector<1x128xf32>
    tpu.vector_store %arg6[%c0_21, %c0_22], %47 {strides = array<i32>} : memref<1x128xf32, #tpu.memory_space<vmem>>, vector<1x128xf32>,
    %c0_i32_23 = arith.constant 0 : i32
    %77 = arith.cmpi eq, %arg1, %c0_i32_23 : i32
    %78 = arith.extui %77 : i1 to i32
    %c0_i32_24 = arith.constant 0 : i32
    %79 = arith.cmpi ne, %78, %c0_i32_24 : i32
    scf.if %79 {
      %c0_25 = arith.constant 0 : index
      %c0_26 = arith.constant 0 : index
      %80 = vector.load %arg7[%c0_25, %c0_26] : memref<1x128xf32, #tpu.memory_space<vmem>>, vector<1x128xf32>
      %81 = tpu.reciprocal %80 {approx = true} : vector<1x128xf32> -> vector<1x128xf32>
      %c0_27 = arith.constant 0 : index
      %c0_28 = arith.constant 0 : index
      %82 = vector.load %arg8[%c0_27, %c0_28] : memref<2x128xf32, #tpu.memory_space<vmem>>, vector<2x128xf32>
      %83 = vector.broadcast %81 : vector<1x128xf32> to vector<2x128xf32>
      %84 = arith.mulf %82, %83 : vector<2x128xf32>
      %c6 = arith.constant 6 : index
      %85 = memref.load %arg2[%c6] : memref<10xf32, #tpu.memory_space<smem>>
      %86 = vector.extract_strided_slice %84 {offsets = [0, 0], sizes = [1, 128], strides = [1, 1]} : vector<2x128xf32> to vector<1x128xf32>
      %87 = vector.broadcast %85 : f32 to vector<1x128xf32>
      %88 = arith.mulf %87, %86 : vector<1x128xf32>
      %c8 = arith.constant 8 : index
      %89 = memref.load %arg2[%c8] : memref<10xf32, #tpu.memory_space<smem>>
      %90 = vector.broadcast %89 : f32 to vector<1x128xf32>
      %91 = arith.addf %88, %90 : vector<1x128xf32>
      %92 = vector.extract_strided_slice %9 {offsets = [0, 0], sizes = [1, 128], strides = [1, 1]} : vector<2x128xf32> to vector<1x128xf32>
      %93 = arith.addf %91, %92 : vector<1x128xf32>
      %94 = vector.extract_strided_slice %9 {offsets = [1, 0], sizes = [1, 128], strides = [1, 1]} : vector<2x128xf32> to vector<1x128xf32>
      %95 = arith.addf %91, %94 : vector<1x128xf32>
      %c7 = arith.constant 7 : index
      %96 = memref.load %arg2[%c7] : memref<10xf32, #tpu.memory_space<smem>>
      %97 = vector.extract_strided_slice %84 {offsets = [0, 0], sizes = [1, 128], strides = [1, 1]} : vector<2x128xf32> to vector<1x128xf32>
      %98 = vector.broadcast %96 : f32 to vector<1x128xf32>
      %99 = arith.mulf %98, %97 : vector<1x128xf32>
      %c9 = arith.constant 9 : index
      %100 = memref.load %arg2[%c9] : memref<10xf32, #tpu.memory_space<smem>>
      %101 = vector.broadcast %100 : f32 to vector<1x128xf32>
      %102 = arith.addf %99, %101 : vector<1x128xf32>
      %103 = vector.extract_strided_slice %9 {offsets = [0, 0], sizes = [1, 128], strides = [1, 1]} : vector<2x128xf32> to vector<1x128xf32>
      %104 = arith.addf %102, %103 : vector<1x128xf32>
      %105 = vector.extract_strided_slice %9 {offsets = [1, 0], sizes = [1, 128], strides = [1, 1]} : vector<2x128xf32> to vector<1x128xf32>
      %106 = arith.addf %102, %105 : vector<1x128xf32>
      %c6_29 = arith.constant 6 : index
      %107 = memref.load %arg2[%c6_29] : memref<10xf32, #tpu.memory_space<smem>>
      %108 = vector.extract_strided_slice %84 {offsets = [1, 0], sizes = [1, 128], strides = [1, 1]} : vector<2x128xf32> to vector<1x128xf32>
      %109 = vector.broadcast %107 : f32 to vector<1x128xf32>
      %110 = arith.mulf %109, %108 : vector<1x128xf32>
      %c8_30 = arith.constant 8 : index
      %111 = memref.load %arg2[%c8_30] : memref<10xf32, #tpu.memory_space<smem>>
      %112 = vector.broadcast %111 : f32 to vector<1x128xf32>
      %113 = arith.addf %110, %112 : vector<1x128xf32>
      %114 = vector.extract_strided_slice %9 {offsets = [0, 0], sizes = [1, 128], strides = [1, 1]} : vector<2x128xf32> to vector<1x128xf32>
      %115 = arith.addf %113, %114 : vector<1x128xf32>
      %116 = vector.extract_strided_slice %9 {offsets = [1, 0], sizes = [1, 128], strides = [1, 1]} : vector<2x128xf32> to vector<1x128xf32>
      %117 = arith.addf %113, %116 : vector<1x128xf32>
      %c7_31 = arith.constant 7 : index
      %118 = memref.load %arg2[%c7_31] : memref<10xf32, #tpu.memory_space<smem>>
      %119 = vector.extract_strided_slice %84 {offsets = [1, 0], sizes = [1, 128], strides = [1, 1]} : vector<2x128xf32> to vector<1x128xf32>
      %120 = vector.broadcast %118 : f32 to vector<1x128xf32>
      %121 = arith.mulf %120, %119 : vector<1x128xf32>
      %c9_32 = arith.constant 9 : index
      %122 = memref.load %arg2[%c9_32] : memref<10xf32, #tpu.memory_space<smem>>
      %123 = vector.broadcast %122 : f32 to vector<1x128xf32>
      %124 = arith.addf %121, %123 : vector<1x128xf32>
      %125 = vector.extract_strided_slice %9 {offsets = [0, 0], sizes = [1, 128], strides = [1, 1]} : vector<2x128xf32> to vector<1x128xf32>
      %126 = arith.addf %124, %125 : vector<1x128xf32>
      %127 = vector.extract_strided_slice %9 {offsets = [1, 0], sizes = [1, 128], strides = [1, 1]} : vector<2x128xf32> to vector<1x128xf32>
      %128 = arith.addf %124, %127 : vector<1x128xf32>
      %129 = tpu.concatenate %93, %95, %104, %106, %115, %117, %126, %128 in 0 : vector<1x128xf32>, vector<1x128xf32>, vector<1x128xf32>, vector<1x128xf32>, vector<1x128xf32>, vector<1x128xf32>, vector<1x128xf32>, vector<1x128xf32> -> vector<8x128xf32>
      %c0_33 = arith.constant 0 : index
      %c0_34 = arith.constant 0 : index
      %130 = vector.load %arg5[%c0_33, %c0_34] : memref<8x128xf32, #tpu.memory_space<vmem>>, vector<8x128xf32>
      tpu.vector_store %arg5[%c0_33, %c0_34], %129 {strides = array<i32>} : memref<8x128xf32, #tpu.memory_space<vmem>>, vector<8x128xf32>,
    } else {
    }
    return
  }
  func.func @transform_0(%arg0: i32, %arg1: i32) -> i32 {
    %c0_i32 = arith.constant 0 : i32
    %c0_i32_0 = arith.constant 0 : i32
    return %c0_i32 : i32
  }
  func.func @transform_1(%arg0: i32, %arg1: i32) -> (i32, i32) {
    %c0_i32 = arith.constant 0 : i32
    %c0_i32_0 = arith.constant 0 : i32
    return %c0_i32, %arg0 : i32, i32
  }
  func.func @transform_2(%arg0: i32, %arg1: i32) -> (i32, i32) {
    %c0_i32 = arith.constant 0 : i32
    %c0_i32_0 = arith.constant 0 : i32
    return %arg1, %c0_i32 : i32, i32
  }
  func.func @transform_3(%arg0: i32, %arg1: i32) -> (i32, i32) {
    %c0_i32 = arith.constant 0 : i32
    %c0_i32_0 = arith.constant 0 : i32
    return %c0_i32, %arg0 : i32, i32
  }
}

</mosaic_0001>

<bundles_post_ra>
// kernel: tpu_custom_call.1
= control target key start
LH: loop header
LB: loop body
LE: loop exit
PB: predicated region body
PF: predicated region fallthrough
CT: control target
= control target key end

     0   :  { %8 = vsyncpa [#allocation7], 0  ;;  %s1104_s0 = inlined_call_operand.vmem [shape: f32[10], index: 0, kind: input, shape index: {}]   ;;  %s1105_s1 = inlined_call_operand.vmem [shape: f32[2,128], index: 1, kind: input, shape index: {}]   ;;  %s1106_s2 = inlined_call_operand.vmem [shape: f32[128,2], index: 2, kind: input, shape index: {}]   ;;  %s1107_s3 = inlined_call_operand.hbm [shape: f32[8,128], index: 3, kind: output, shape index: {}]  }
   0x1   :  { %9 = vsyncpa [#allocation6], 0  ;;  %s16_s14 = sshll.u32 %s1104_s0, 4  ;;  %s17_s14 = int_to_ptr.vmem [resolvable:$true] %s16_s14 }
   0x2   :  { %s881_s15 = scalar_lea.vmem %s17_s14, 16  ;;  %p886_p1 = scmp.lt.s32.totalorder %s17_s14, %s17_s14 }
   0x3   :  { %p882_p0 = scmp.ne.s32.totalorder %s17_s14, %s881_s15  ;;  %p887_p2 = scmp.lt.s32.totalorder %s881_s15, %s881_s15 }
   0x5   :  { %p888_p3 = por %p887_p2, %p886_p1 }
   0x7   :  { %p889_p4 = pnand %p888_p3, %p882_p0 }
   0x9   :  { %892 = shalt.err (!%p889_p4)
}
   0xa   :  { %s917_s16 = smov [#allocation5]  }
   0xb   :  { %19 = dma.vmem_to_smem %s17_s14, 16, %s917_s16, [#allocation7]  }
   0xc   :  { %913 = dma.done.wait [#allocation7], 16  }
   0xd   :  { %914 = vsyncadd [#allocation7], 4294967280 }
   0xe   :  { %27 = sfence }
   0xf   :  { %s851_s17 = sld [smem:[#allocation5 + $0x2]]  ;;  %v918_v0 = vmov 1   ;;  %v919_v1 = vmov 0   ;;  %v42_v2 = vld [vmem:[%s1106_s2] sm:$0xff]  ;;  %v43_v3 = vld [vmem:[%s1106_s2 + $0x8] sm:$0xff]  ;;  %v44_v16 = vld [vmem:[%s1106_s2 + $0x10] sm:$0xff]  ;;  %v210_v60 = vlaneseq }
  0x10   :  { %866 = vset.pattern.permute.xlu1 %v918_v0  ;;  %865 = vset.pattern.permute.xlu0 %v919_v1  ;;  %s852_s18 = sld [smem:[#allocation5 + $0x3]]  ;;  %v920_v17 = vmov -inf   ;;  %v45_v19 = vld [vmem:[%s1106_s2 + $0x18] sm:$0xff]  ;;  %v46_v22 = vld [vmem:[%s1106_s2 + $0x20] sm:$0xff]  ;;  %v47_v25 = vld [vmem:[%s1106_s2 + $0x28] sm:$0xff]  ;;  %v921_v38 = vmov 0.0  }
  0x11   :  { %s853_s0 = sld [smem:[#allocation5 + $0x4]]  ;;  %32 = vst [vmem:[#allocation2] sm:$0x1] %v920_v17  ;;  %v48_v28 = vld [vmem:[%s1106_s2 + $0x30] sm:$0xff]  ;;  %v49_v31 = vld [vmem:[%s1106_s2 + $0x38] sm:$0xff]  ;;  %v50_v34 = vld [vmem:[%s1106_s2 + $0x40] sm:$0xff] }
  0x12   :  { %s854_s23 = sld [smem:[#allocation5 + $0x5]]  ;;  %v51_v37 = vld [vmem:[%s1106_s2 + $0x48] sm:$0xff]  ;;  %33 = vst [vmem:[#allocation3] sm:$0x1] %v921_v38  ;;  %34 = vst [vmem:[#allocation4] sm:$0x3] %v921_v38 }
  0x13   :  { %v52_v41 = vld [vmem:[%s1106_s2 + $0x50] sm:$0xff]  ;;  %v53_v44 = vld [vmem:[%s1106_s2 + $0x58] sm:$0xff]  ;;  %v54_v47 = vld [vmem:[%s1106_s2 + $0x60] sm:$0xff]  ;;  %s35_s24 = sld [smem:[#allocation5]]  ;;  %v211_v63 = vshrl.u32 %v210_v60, 7  ;;  %vm752_vm0 = vcmask 1040384  }
  0x14   :  { %v55_v50 = vld [vmem:[%s1106_s2 + $0x68] sm:$0xff]  ;;  %v56_v53 = vld [vmem:[%s1106_s2 + $0x70] sm:$0xff]  ;;  %v57_v56 = vld [vmem:[%s1106_s2 + $0x78] sm:$0xff]  ;;  %s850_s25 = sld [smem:[#allocation5 + $0x1]]  ;;  %vm822_vm1 = vcmask 1041408   ;;  %vm824_vm2 = vcmask 1042432  }
  0x15   :  { %v62_v4 = vstv %s851_s17  ;;  %v1033_v61 = vld [vmem:[%s1105_s1] sm:$0x3]  ;;  %s855_s1 = sld [smem:[#allocation5 + $0x6]]  ;;  %vm826_vm3 = vcmask 1043456   ;;  %vm828_vm4 = vcmask 1044480   ;;  %vm830_vm5 = vcmask 1045504  }
  0x16   :  { %v63_v5 = vmul.f32 %v62_v4, %v42_v2  ;;  %v64_v6 = vmul.f32 %v62_v4, %v43_v3  ;;  %v79_v7 = vstv %s852_s18  ;;  %s857_s2 = sld [smem:[#allocation5 + $0x7]]  ;;  %s922_s30 = smov [#allocation8]   ;;  %vm832_vm6 = vcmask 1046528  }
  0x17   :  { %v952_v8 = vstv %s853_s0  ;;  %s856_s28 = sld [smem:[#allocation5 + $0x8]]  ;;  %s841_s4 = sshll.u32 %s922_s30, 4  ;;  %s842_s4 = int_to_ptr.vmem [resolvable:$true] %s841_s4 }
  0x18   :  { %v80_v9 = vadd.f32 %v79_v7, %v63_v5  ;;  %v81_v10 = vadd.f32 %v79_v7, %v64_v6  ;;  %v97_v11 = vmul.f32 %v952_v8, %v42_v2  ;;  %v955_v12 = vstv %s854_s23  ;;  %s858_s29 = sld [smem:[#allocation5 + $0x9]]  ;;  %s893_s5 = scalar_lea.vmem %s842_s4, 128 }
  0x19   :  { %v98_v13 = vmul.f32 %v952_v8, %v43_v3  ;;  %v99_v18 = vmul.f32 %v952_v8, %v44_v16  ;;  %v100_v21 = vmul.f32 %v952_v8, %v45_v19  ;;  %v101_v24 = vmul.f32 %v952_v8, %v46_v22  ;;  %p894_p5 = scmp.ne.s32.totalorder %s842_s4, %s893_s5  ;;  %p898_p6 = scmp.lt.s32.totalorder %s842_s4, %s842_s4 }
  0x1a   :  { %231 = vperm.xlu1 %866, %v80_v9   ;;  %132 = vperm.xlu0 %865, %v80_v9   ;;  %v114_v14 = vadd.f32 %v955_v12, %v97_v11  ;;  %v102_v27 = vmul.f32 %v952_v8, %v47_v25  ;;  %v103_v30 = vmul.f32 %v952_v8, %v48_v28  ;;  %v58_v62 = vstv %s35_s24  ;;  %p899_p7 = scmp.lt.s32.totalorder %s893_s5, %s893_s5 }
  0x1b   :  { %v115_v15 = vadd.f32 %v955_v12, %v98_v13  ;;  %v116_v20 = vadd.f32 %v955_v12, %v99_v18  ;;  %v117_v23 = vadd.f32 %v955_v12, %v100_v21  ;;  %v118_v26 = vadd.f32 %v955_v12, %v101_v24 }
  0x1c   :  { %v119_v29 = vadd.f32 %v955_v12, %v102_v27  ;;  %v120_v32 = vadd.f32 %v955_v12, %v103_v30  ;;  %v104_v33 = vmul.f32 %v952_v8, %v49_v31  ;;  %v105_v36 = vmul.f32 %v952_v8, %v50_v34  ;;  %p900_p8 = por %p899_p7, %p898_p6 }
  0x1d   :  { %v106_v40 = vmul.f32 %v952_v8, %v51_v37  ;;  %v107_v43 = vmul.f32 %v952_v8, %v52_v41  ;;  %v108_v46 = vmul.f32 %v952_v8, %v53_v44  ;;  %v109_v49 = vmul.f32 %v952_v8, %v54_v47 }
  0x1e   :  { %235 = vperm.xlu1 %866, %v81_v10   ;;  %137 = vperm.xlu0 %865, %v81_v10   ;;  %v121_v35 = vadd.f32 %v955_v12, %v104_v33  ;;  %v122_v39 = vadd.f32 %v955_v12, %v105_v36  ;;  %v110_v52 = vmul.f32 %v952_v8, %v55_v50  ;;  %v1036_v2 = vsub.s32 0, %v211_v63  ;;  %p901_p9 = pnand %p900_p8, %p894_p5 }
  0x1f   :  { %v123_v42 = vadd.f32 %v955_v12, %v106_v40  ;;  %v124_v45 = vadd.f32 %v955_v12, %v107_v43  ;;  %v125_v48 = vadd.f32 %v955_v12, %v108_v46  ;;  %v126_v51 = vadd.f32 %v955_v12, %v109_v49 }
  0x20   :  { %v127_v54 = vadd.f32 %v955_v12, %v110_v52  ;;  %v111_v55 = vmul.f32 %v952_v8, %v56_v53  ;;  %v112_v58 = vmul.f32 %v952_v8, %v57_v56  ;;  %v296_v3 = vsub.s32 1, %v211_v63 }
  0x22   :  { %867 = vset.pattern.permute.xlu1 %v919_v1  ;;  %536 = vperm.xlu0 %865, %v114_v14   ;;  %v128_v57 = vadd.f32 %v955_v12, %v111_v55  ;;  %v129_v59 = vadd.f32 %v955_v12, %v112_v58 }
  0x23   :  { %541 = vperm.xlu1 %867, %v115_v15  }
  0x26   :  { %868 = vset.pattern.permute.xlu0 %v918_v0 }
  0x27   :  { %869 = vset.pattern.permute.xlu1 %v918_v0  ;;  %652 = vperm.xlu0 %868, %v114_v14   ;;  %v59_v0 = vmul.f32 %v58_v62, %v1033_v61 }
  0x28   :  { %656 = vperm.xlu1 %869, %v115_v15  }
  0x2b   :  { %660 = vperm.xlu0 %868, %v116_v20  }
  0x2c   :  { %870 = vset.pattern.permute.xlu1 %v919_v1  ;;  %v60_v1 = vstv %s850_s25 }
  0x2d   :  { %546 = vperm.xlu1 %870, %v116_v20   ;;  %v61_v4 = vadd.f32 %v60_v1, %v59_v0 }
  0x2f   :  { %664 = vperm.xlu0 %868, %v117_v23   ;;  %v297_v5 = vrot.slane %v61_v4, %v296_v3  ;;  %v213_v6 = vrot.slane %v61_v4, %v1036_v2 }
  0x31   :  { %551 = vperm.xlu1 %870, %v117_v23  }
  0x33   :  { %668 = vperm.xlu0 %868, %v118_v26  }
  0x35   :  { %556 = vperm.xlu1 %870, %v118_v26  }
  0x37   :  { %672 = vperm.xlu0 %868, %v119_v29  }
  0x39   :  { %561 = vperm.xlu1 %870, %v119_v29   ;;  %v1039_v29 = vld [vmem:[#allocation2] sm:$0x1] }
  0x3b   :  { %676 = vperm.xlu0 %868, %v120_v32  }
  0x3d   :  { %566 = vperm.xlu1 %870, %v120_v32  }
  0x3f   :  { %680 = vperm.xlu0 %868, %v121_v35  }
  0x41   :  { %571 = vperm.xlu1 %870, %v121_v35  }
  0x43   :  { %684 = vperm.xlu0 %868, %v122_v39  }
  0x45   :  { %576 = vperm.xlu1 %870, %v122_v39  }
  0x47   :  { %688 = vperm.xlu0 %868, %v123_v42  }
  0x49   :  { %581 = vperm.xlu1 %870, %v123_v42  }
  0x4b   :  { %692 = vperm.xlu0 %868, %v124_v45  }
  0x4d   :  { %586 = vperm.xlu1 %870, %v124_v45  }
  0x4f   :  { %696 = vperm.xlu0 %868, %v125_v48  }
  0x51   :  { %591 = vperm.xlu1 %870, %v125_v48  }
  0x53   :  { %700 = vperm.xlu0 %868, %v126_v51  }
  0x55   :  { %596 = vperm.xlu1 %870, %v126_v51  }
  0x57   :  { %704 = vperm.xlu0 %868, %v127_v54  }
  0x59   :  { %601 = vperm.xlu1 %870, %v127_v54  }
  0x5b   :  { %708 = vperm.xlu0 %868, %v128_v57  }
  0x5d   :  { %606 = vperm.xlu1 %870, %v128_v57  }
  0x5f   :  { %712 = vperm.xlu0 %868, %v129_v59  }
  0x61   :  { %611 = vperm.xlu1 %870, %v129_v59  }
  0x95   :  { %v232_v7 = vpop.permute.xlu1 %231  ;;  %v133_v8 = vpop.permute.xlu0 %132 }
  0x96   :  { %v298_v9 = vmul.f32 %v297_v5, %v232_v7  ;;  %v214_v10 = vmul.f32 %v213_v6, %v133_v8 }
  0x98   :  { %v314_v15 = vadd.f32 %v298_v9, %v214_v10 }
  0x99   :  { %v236_v11 = vpop.permute.xlu1 %235  ;;  %v138_v12 = vpop.permute.xlu0 %137 }
  0x9a   :  { %v299_v13 = vmul.f32 %v297_v5, %v236_v11  ;;  %v215_v14 = vmul.f32 %v213_v6, %v138_v12 }
  0x9c   :  { %v315_v16 = vadd.f32 %v299_v13, %v215_v14 }
  0x9d   :  { %v537_v17 = vpop.permute.xlu0 %536 }
  0x9e   :  { %v441_v18 = vmax.f32 %v314_v15, %v315_v16  ;;  %v542_v19 = vpop.permute.xlu1 %541 }
  0xa0   :  { %v444_v20 = vrot.slane %v441_v18, 4 }
  0xa2   :  { %v445_v21 = vmax.f32 %v441_v18, %v444_v20  ;;  %v653_v22 = vpop.permute.xlu0 %652 }
  0xa3   :  { %v657_v23 = vpop.permute.xlu1 %656 }
  0xa4   :  { %v446_v24 = vrot.slane %v445_v21, 2 }
  0xa6   :  { %v447_v25 = vmax.f32 %v445_v21, %v446_v24  ;;  %v661_v26 = vpop.permute.xlu0 %660 }
  0xa8   :  { %v448_v27 = vrot.slane %v447_v25, 1  ;;  %v547_v28 = vpop.permute.xlu1 %546 }
  0xaa   :  { %v449_v30 = vmax.f32 %v447_v25, %v448_v27  ;;  %v665_v31 = vpop.permute.xlu0 %664 }
  0xac   :  { %v1042_v32 = vmax.f32 %v1039_v29, %v449_v30  ;;  %v552_v33 = vpop.permute.xlu1 %551 }
  0xae   :  { %v459_v34 = vrot.slane %v1042_v32, %v1036_v2  ;;  %764 = vst [vmem:[#allocation2] sm:$0x1] %v1042_v32  ;;  %v669_v35 = vpop.permute.xlu0 %668 }
  0xb0   :  { %v461_v36 = vsub.f32 %v314_v15, %v459_v34  ;;  %v462_v37 = vsub.f32 %v315_v16, %v459_v34  ;;  %v463_v38 = vsub.f32 -inf, %v459_v34  ;;  %v557_v39 = vpop.permute.xlu1 %556 }
  0xb2   :  { %v477_v40 = vmul.f32 1.442695, %v461_v36  ;;  %v479_v41 = vmul.f32 1.442695, %v462_v37  ;;  %v481_v42 = vmul.f32 1.442695, %v463_v38  ;;  %v673_v43 = vpop.permute.xlu0 %672 }
  0xb4   :  { %871 = vpow2.f32 %v477_v40  ;;  %v562_v44 = vpop.permute.xlu1 %561 }
  0xb5   :  { %873 = vpow2.f32 %v479_v41 }
  0xb6   :  { %875 = vpow2.f32 %v481_v42  ;;  %v677_v45 = vpop.permute.xlu0 %676  ;;  %v452_v42 = vsub.f32 %v1039_v29, %v1042_v32 }
  0xb8   :  { %v567_v46 = vpop.permute.xlu1 %566 }
  0xba   :  { %v681_v47 = vpop.permute.xlu0 %680 }
  0xbc   :  { %v572_v48 = vpop.permute.xlu1 %571 }
  0xbe   :  { %v685_v49 = vpop.permute.xlu0 %684 }
  0xc0   :  { %v577_v50 = vpop.permute.xlu1 %576 }
  0xc1   :  { %v872_v51 = vpop.eup %871 }
  0xc2   :  { %v874_v52 = vpop.eup %873  ;;  %v614_v53 = vmul.f32 %v872_v51, %v537_v17  ;;  %v715_v54 = vmul.f32 %v872_v51, %v653_v22  ;;  %v689_v55 = vpop.permute.xlu0 %688 }
  0xc3   :  { %v1047_v56 = vpop.eup %875  ;;  %v511_v57 = vadd.f32 %v874_v52, %v872_v51  ;;  %v615_v58 = vmul.f32 %v874_v52, %v542_v19  ;;  %v716_v59 = vmul.f32 %v874_v52, %v657_v23 }
  0xc4   :  { %v717_v60 = vmul.f32 %v1047_v56, %v661_v26  ;;  %v582_v62 = vpop.permute.xlu1 %581  ;;  %v616_v3 = vmul.f32 %v1047_v56, %v547_v28  ;;  %v718_v4 = vmul.f32 %v1047_v56, %v665_v31  ;;  %v617_v9 = vmul.f32 %v1047_v56, %v552_v33 }
  0xc5   :  { %v512_v63 = vadd.f32 %v1047_v56, %v511_v57  ;;  %v630_v0 = vadd.f32 %v615_v58, %v614_v53  ;;  %v731_v1 = vadd.f32 %v716_v59, %v715_v54  ;;  %v719_v10 = vmul.f32 %v1047_v56, %v669_v35 }
  0xc6   :  { %v693_v5 = vpop.permute.xlu0 %692  ;;  %v618_v15 = vmul.f32 %v1047_v56, %v557_v39  ;;  %v720_v16 = vmul.f32 %v1047_v56, %v673_v43  ;;  %v619_v21 = vmul.f32 %v1047_v56, %v562_v44  ;;  %v721_v22 = vmul.f32 %v1047_v56, %v677_v45 }
  0xc7   :  { %v513_v6 = vadd.f32 %v1047_v56, %v512_v63  ;;  %v732_v7 = vadd.f32 %v731_v1, %v717_v60  ;;  %v631_v8 = vadd.f32 %v630_v0, %v616_v3  ;;  %v620_v27 = vmul.f32 %v1047_v56, %v567_v46 }
  0xc8   :  { %v587_v11 = vpop.permute.xlu1 %586  ;;  %v722_v28 = vmul.f32 %v1047_v56, %v681_v47  ;;  %v621_v35 = vmul.f32 %v1047_v56, %v572_v48  ;;  %v723_v36 = vmul.f32 %v1047_v56, %v685_v49  ;;  %v622_v41 = vmul.f32 %v1047_v56, %v577_v50 }
  0xc9   :  { %v514_v12 = vadd.f32 %v1047_v56, %v513_v6  ;;  %v733_v13 = vadd.f32 %v732_v7, %v718_v4  ;;  %v632_v14 = vadd.f32 %v631_v8, %v617_v9  ;;  %v724_v43 = vmul.f32 %v1047_v56, %v689_v55 }
  0xca   :  { %v697_v17 = vpop.permute.xlu0 %696  ;;  %v623_v47 = vmul.f32 %v1047_v56, %v582_v62  ;;  %v725_v49 = vmul.f32 %v1047_v56, %v693_v5  ;;  %v624_v54 = vmul.f32 %v1047_v56, %v587_v11  ;;  %v453_v57 = vmul.f32 1.442695, %v452_v42 }
  0xcb   :  { %v515_v18 = vadd.f32 %v1047_v56, %v514_v12  ;;  %v734_v19 = vadd.f32 %v733_v13, %v719_v10  ;;  %v633_v20 = vadd.f32 %v632_v14, %v618_v15  ;;  %v726_v29 = vmul.f32 %v1047_v56, %v697_v17 }
  0xcc   :  { %v592_v23 = vpop.permute.xlu1 %591  ;;  %877 = vpow2.f32 %v453_v57 }
  0xcd   :  { %v516_v24 = vadd.f32 %v1047_v56, %v515_v18  ;;  %v735_v25 = vadd.f32 %v734_v19, %v720_v16  ;;  %v634_v26 = vadd.f32 %v633_v20, %v619_v21  ;;  %v625_v59 = vmul.f32 %v1047_v56, %v592_v23 }
  0xce   :  { %v701_v30 = vpop.permute.xlu0 %700 }
  0xcf   :  { %v517_v31 = vadd.f32 %v1047_v56, %v516_v24  ;;  %v736_v33 = vadd.f32 %v735_v25, %v721_v22  ;;  %v635_v34 = vadd.f32 %v634_v26, %v620_v27  ;;  %v727_v62 = vmul.f32 %v1047_v56, %v701_v30 }
  0xd0   :  { %v597_v37 = vpop.permute.xlu1 %596 }
  0xd1   :  { %v518_v38 = vadd.f32 %v1047_v56, %v517_v31  ;;  %v737_v39 = vadd.f32 %v736_v33, %v722_v28  ;;  %v636_v40 = vadd.f32 %v635_v34, %v621_v35  ;;  %v626_v3 = vmul.f32 %v1047_v56, %v597_v37  ;;  %v509_v37 = vld [vmem:[#allocation3] sm:$0x1] }
  0xd2   :  { %v705_v44 = vpop.permute.xlu0 %704 }
  0xd3   :  { %v738_v45 = vadd.f32 %v737_v39, %v723_v36  ;;  %v637_v46 = vadd.f32 %v636_v40, %v622_v41  ;;  %v519_v48 = vadd.f32 %v1047_v56, %v518_v38  ;;  %v728_v5 = vmul.f32 %v1047_v56, %v705_v44 }
  0xd4   :  { %v602_v51 = vpop.permute.xlu1 %601 }
  0xd5   :  { %v739_v52 = vadd.f32 %v738_v45, %v724_v43  ;;  %v638_v53 = vadd.f32 %v637_v46, %v623_v47  ;;  %v520_v50 = vadd.f32 %v1047_v56, %v519_v48  ;;  %v627_v8 = vmul.f32 %v1047_v56, %v602_v51  ;;  %v754_v45 = vld [vmem:[#allocation4] sm:$0x3] }
  0xd6   :  { %v709_v32 = vpop.permute.xlu0 %708 }
  0xd7   :  { %v740_v55 = vadd.f32 %v739_v52, %v725_v49  ;;  %v639_v58 = vadd.f32 %v638_v53, %v624_v54  ;;  %v521_v60 = vadd.f32 %v1047_v56, %v520_v50  ;;  %v729_v10 = vmul.f32 %v1047_v56, %v709_v32 }
  0xd8   :  { %v607_v63 = vpop.permute.xlu1 %606  ;;  %v790_v32 = vstv %s857_s2 }
  0xd9   :  { %v741_v0 = vadd.f32 %v740_v55, %v726_v29  ;;  %v640_v1 = vadd.f32 %v639_v58, %v625_v59  ;;  %v522_v4 = vadd.f32 %v1047_v56, %v521_v60  ;;  %v628_v11 = vmul.f32 %v1047_v56, %v607_v63  ;;  %v878_v33 = vpop.eup %877 }
  0xda   :  { %v713_v12 = vpop.permute.xlu0 %712  ;;  %v759_v41 = vrot.slane %v878_v33, %v1036_v2  ;;  %v510_v42 = vmul.f32 %v878_v33, %v509_v37  ;;  %v779_v29 = vstv %s855_s1  ;;  %v782_v58 = vstv %s856_s28 }
  0xdb   :  { %v742_v6 = vadd.f32 %v741_v0, %v727_v62  ;;  %v641_v7 = vadd.f32 %v640_v1, %v626_v3  ;;  %v523_v9 = vadd.f32 %v1047_v56, %v522_v4  ;;  %v730_v20 = vmul.f32 %v1047_v56, %v713_v12 }
  0xdc   :  { %v612_v13 = vpop.permute.xlu1 %611  ;;  %v761_v49 = vmul.f32 %v759_v41, %v754_v45  ;;  %v793_v59 = vstv %s858_s29  ;;  %v786_v62 = vrot.slane %v1033_v61, 1  ;;  %v797_v0 = vrot.slane %v1033_v61, 7 }
  0xdd   :  { %v743_v14 = vadd.f32 %v742_v6, %v728_v5  ;;  %v642_v15 = vadd.f32 %v641_v7, %v627_v8  ;;  %v524_v16 = vadd.f32 %v1047_v56, %v523_v9  ;;  %v629_v17 = vmul.f32 %v1047_v56, %v612_v13 }
  0xdf   :  { %v744_v18 = vadd.f32 %v743_v14, %v729_v10  ;;  %v643_v19 = vadd.f32 %v642_v15, %v628_v11  ;;  %v525_v21 = vadd.f32 %v1047_v56, %v524_v16 }
  0xe1   :  { %v745_v22 = vadd.f32 %v744_v18, %v730_v20  ;;  %v526_v23 = vrot.slane %v525_v21, 4  ;;  %v644_v24 = vadd.f32 %v643_v19, %v629_v17 }
  0xe3   :  { %v746_v25 = vrot.slane %v745_v22, 4  ;;  %v527_v26 = vadd.f32 %v526_v23, %v525_v21  ;;  %v645_v27 = vrot.slane %v644_v24, 4 }
  0xe5   :  { %v747_v28 = vadd.f32 %v746_v25, %v745_v22  ;;  %v528_v30 = vrot.slane %v527_v26, 2  ;;  %v646_v31 = vadd.f32 %v645_v27, %v644_v24 }
  0xe7   :  { %v748_v34 = vrot.slane %v747_v28, 2  ;;  %v529_v35 = vadd.f32 %v528_v30, %v527_v26  ;;  %v647_v36 = vrot.slane %v646_v31, 2 }
  0xe9   :  { %v749_v38 = vadd.f32 %v748_v34, %v747_v28  ;;  %v530_v39 = vrot.slane %v529_v35, 1  ;;  %v648_v40 = vadd.f32 %v647_v36, %v646_v31 }
  0xeb   :  { %v750_v56 = vrot.slane %v749_v38, 1  ;;  %v531_v43 = vadd.f32 %v530_v39, %v529_v35  ;;  %v649_v44 = vrot.slane %v648_v40, 1 }
  0xed   :  { %v751_v46 = vadd.f32 %v750_v56, %v749_v38  ;;  %v532_v47 = vadd.f32 %v531_v43, %v510_v42  ;;  %v650_v48 = vadd.f32 %v649_v44, %v648_v40 }
  0xef   :  { %533 = vst [vmem:[#allocation3] sm:$0x1] %v532_v47  ;;  %v753_v51 = vsel %vm752_vm0, %v650_v48, %v751_v46 }
  0xf0   :  { %v762_v52 = vadd.f32 %v761_v49, %v753_v51 }
  0xf2   :  { %763 = vst [vmem:[#allocation4] sm:$0x3] %v762_v52 }
  0xf6   :  { %v768_v53 = vld [vmem:[#allocation3] sm:$0x1] }
  0xf7   :  { %879 = vrcp.f32 %v768_v53 }
  0xf9   :  { %v770_v57 = vld [vmem:[#allocation4] sm:$0x3] }
 0x104   :  { %v880_v54 = vpop.eup %879 }
 0x105   :  { %v775_v50 = vrot.slane %v880_v54, %v1036_v2 }
 0x107   :  { %v777_v55 = vmul.f32 %v775_v50, %v770_v57 }
 0x109   :  { %v780_v60 = vmul.f32 %v779_v29, %v777_v55  ;;  %v791_v63 = vmul.f32 %v790_v32, %v777_v55 }
 0x10b   :  { %v783_v1 = vadd.f32 %v782_v58, %v780_v60  ;;  %v794_v3 = vadd.f32 %v793_v59, %v791_v63 }
 0x10d   :  { %v788_v4 = vadd.f32 %v786_v62, %v783_v1  ;;  %v795_v5 = vadd.f32 %v794_v3, %v1033_v61  ;;  %v796_v6 = vadd.f32 %v794_v3, %v786_v62  ;;  %v799_v7 = vadd.f32 %v797_v0, %v783_v1 }
 0x10e   :  { %v784_v2 = vadd.f32 %v783_v1, %v1033_v61  ;;  %v800_v10 = vadd.f32 %v797_v0, %v794_v3 }
 0x10f   :  { %v802_v8 = vrot.slane %v788_v4, 7  ;;  %v805_v9 = vrot.slane %v795_v5, 6  ;;  %v808_v11 = vrot.slane %v796_v6, 5  ;;  %v811_v13 = vrot.slane %v799_v7, 5 }
 0x110   :  { %v814_v15 = vrot.slane %v784_v2, 4  ;;  %v817_v17 = vrot.slane %v800_v10, 3  ;;  %v819_v61 = vrot.slane %v795_v5, 2 }
 0x111   :  { %v821_v12 = vsel %vm752_vm0, %v784_v2, %v802_v8 }
 0x112   :  { %v823_v14 = vsel %vm822_vm1, %v821_v12, %v805_v9 }
 0x113   :  { %v825_v16 = vsel %vm824_vm2, %v823_v14, %v808_v11 }
 0x114   :  { %v827_v18 = vsel %vm826_vm3, %v825_v16, %v811_v13 }
 0x115   :  { %v829_v19 = vsel %vm828_vm4, %v827_v18, %v814_v15 }
 0x116   :  { %v831_v20 = vsel %vm830_vm5, %v829_v19, %v817_v17 }
 0x117   :  { %v833_v21 = vsel %vm832_vm6, %v831_v20, %v819_v61 }
 0x118   :  { %834 = vst [vmem:[#allocation8] sm:$0xff] %v833_v21 }
 0x119   :  { %904 = shalt.err (!%p901_p9)
}
 0x11a   :  { %844 = dma.vmem_to_hbm [thread:$0]  %s842_s4, 128, %s1107_s3, [#allocation6]  }
 0x11b   :  { %915 = dma.done.wait [#allocation6], 128  }
 0x11c   :  { %916 = vsyncadd [#allocation6], 4294967168 }
 0x11d   :  { %848 = vsyncpa [#allocation6], 1 }
 0x11e   :  { %849 = vsyncpa [#allocation7], 1 }

</bundles_post_ra>
